<compile_context>
chip_gen: v5e
topology: v5e:2x2
jax: 0.10.0
libtpu: 0.0.40
codegen_flags: <defaults>
</compile_context>

<pallas_src>
import jax
import jax.numpy as jnp
from jax.experimental import pallas as pl
from jax.experimental.pallas import tpu as pltpu


# ----------------------------- helpers -------------------------------------
def _round_up(x: int, m: int) -> int:
    return ((x + m - 1) // m) * m


def _sublane_min(dtype) -> int:
    bits = jnp.dtype(dtype).itemsize * 8
    return {32: 8, 16: 16, 8: 32}.get(bits, 8)


def _vmem_capacity_bytes() -> int:
    try:
        return int(pltpu.get_tpu_info().vmem_capacity_bytes)
    except Exception:
        return 64 << 20  # conservative (v7x per-TC physical VMEM)


def _pick_tile(extent: int, cap: int, want_multi: bool) -> int:
    """Largest multiple of 128 that divides `extent` (a multiple of 128), is
    <= cap, and — if want_multi and extent > 128 — leaves >= 2 blocks."""
    lanes = extent // 128
    best = 128
    for t in range(1, lanes + 1):
        if lanes % t or t * 128 > cap:
            continue
        if want_multi and lanes > 1 and lanes // t < 2:
            continue
        best = t * 128
    return best


def _choose_tiles(B, H_in, H_out, compute_dtype, out_dtype):
    """Derive (tm, tn, tk) from the problem size and the queried VMEM budget."""
    sub = _sublane_min(compute_dtype)
    comp_sz = jnp.dtype(compute_dtype).itemsize
    out_sz = jnp.dtype(out_dtype).itemsize

    budget = int(_vmem_capacity_bytes() * 0.45)  # headroom for Mosaic internals

    Kp0 = _round_up(H_in, 128)
    Np0 = _round_up(H_out, 128)

    tm = min(_round_up(B, sub), 512)
    grid_m = pl.cdiv(_round_up(B, sub), tm)

    def footprint(tm_, tn_, tk_):
        # double-buffered x/W tiles + double-buffered out tile + bias + f32 acc
        return (2 * (tm_ * tk_ + tk_ * tn_) * comp_sz
                + 2 * tm_ * tn_ * out_sz
                + 2 * tn_ * 4
                + tm_ * tn_ * 4)

    cap_k, cap_n = 2048, 512
    while True:
        tk = _pick_tile(Kp0, cap_k, want_multi=False)
        tn = _pick_tile(Np0, cap_n, want_multi=(grid_m == 1))  # feed v7x core #2
        if footprint(tm, tn, tk) <= budget:
            break
        if cap_k > 128:
            cap_k //= 2
        elif cap_n > 128:
            cap_n //= 2
        elif tm > sub:
            tm = max(sub, _round_up(tm // 2, sub))
        else:
            break
    return tm, tn, tk


# ----------------------------- kernels -------------------------------------
def _mlp_kernel_f32_out(x_ref, w_ref, b_ref, o_ref):
    # x_ref: (tm, tk) bf16   w_ref: (tk, tn) bf16   b_ref: (1, tn) f32
    # o_ref: (tm, tn) f32 — VMEM-resident across k, used as the accumulator.
    k = pl.program_id(2)

    @pl.when(k == 0)
    def _():
        o_ref[...] = jnp.zeros_like(o_ref)

    o_ref[...] += jnp.dot(x_ref[...], w_ref[...],
                          preferred_element_type=jnp.float32)

    @pl.when(k == pl.num_programs(2) - 1)
    def _():
        o_ref[...] = jnp.tanh(o_ref[...] + b_ref[...].astype(jnp.float32))


def _mlp_kernel_lowp_out(x_ref, w_ref, b_ref, o_ref, acc_ref):
    # Low-precision output: keep an f32 scratch accumulator, finalize tanh in
    # the output dtype (bf16 EUP path on v6e/v7x).
    k = pl.program_id(2)

    @pl.when(k == 0)
    def _():
        acc_ref[...] = jnp.zeros_like(acc_ref)

    acc_ref[...] += jnp.dot(x_ref[...], w_ref[...],
                            preferred_element_type=jnp.float32)

    @pl.when(k == pl.num_programs(2) - 1)
    def _():
        y = acc_ref[...] + b_ref[...].astype(jnp.float32)
        o_ref[...] = jnp.tanh(y.astype(o_ref.dtype))


# ----------------------------- wrappers ------------------------------------
def prepare_params(weight, bias, tn, tk, compute_dtype=jnp.bfloat16):
    """One-time (parameter-load) prep: transpose W to [H_in, H_out], pad to
    tile multiples, cast to the MXU compute dtype. Not a per-call cost."""
    H_out, H_in = weight.shape
    Kp = _round_up(H_in, tk)
    Np = _round_up(H_out, tn)
    w_kn = weight.T                                   # [H_in, H_out], one-time
    if (Kp, Np) != (H_in, H_out):
        w_kn = jnp.pad(w_kn, ((0, Kp - H_in), (0, Np - H_out)))
    w_kn = w_kn.astype(compute_dtype)
    b = bias if Np == H_out else jnp.pad(bias, (0, Np - H_out))
    return w_kn, b.reshape(1, Np).astype(jnp.float32)


def mlp_layer_pallas(features, w_kn, b2d, H_out, *, tm, tn, tk, compute_dtype):
    """features: [B, H_in]; w_kn: [Kp, Np] (pre-transposed/padded); b2d: [1, Np]."""
    B, H_in = features.shape
    Kp, Np = w_kn.shape
    out_dtype = features.dtype
    Bp = _round_up(B, tm)

    # Pad/cast only the (small) activation per call.
    xp = features.astype(compute_dtype)
    if (Bp, Kp) != (B, H_in):
        xp = jnp.pad(xp, ((0, Bp - B), (0, Kp - H_in)))

    grid = (Bp // tm, Np // tn, Kp // tk)
    gm, gn, _ = grid

    comp_sz = jnp.dtype(compute_dtype).itemsize
    out_sz = jnp.dtype(out_dtype).itemsize
    cost = pl.CostEstimate(
        flops=2 * Bp * Kp * Np,
        transcendentals=Bp * Np,
        bytes_accessed=(gn * xp.size * comp_sz        # x is re-read per N block
                        + gm * w_kn.size * comp_sz    # W is re-read per M block
                        + gm * b2d.size * 4
                        + Bp * Np * out_sz),
    )

    vmem_limit = int(min(_vmem_capacity_bytes(), 128 << 20) * 3 // 4)

    if jnp.dtype(out_dtype) == jnp.dtype(jnp.float32):
        kernel, scratch = _mlp_kernel_f32_out, []
    else:
        kernel, scratch = _mlp_kernel_lowp_out, [pltpu.VMEM((tm, tn), jnp.float32)]

    out_p = pl.pallas_call(
        kernel,
        out_shape=jax.ShapeDtypeStruct((Bp, Np), out_dtype),
        grid_spec=pltpu.PrefetchScalarGridSpec(
            num_scalar_prefetch=0,
            grid=grid,
            in_specs=[
                pl.BlockSpec((tm, tk), lambda m, n, k: (m, k)),   # x
                pl.BlockSpec((tk, tn), lambda m, n, k: (k, n)),   # W, [K, N]
                pl.BlockSpec((1, tn), lambda m, n, k: (0, n)),    # bias
            ],
            out_specs=pl.BlockSpec((tm, tn), lambda m, n, k: (m, n)),
            scratch_shapes=scratch,
        ),
        compiler_params=pltpu.CompilerParams(
            dimension_semantics=("parallel", "parallel", "arbitrary"),
            vmem_limit_bytes=vmem_limit,
        ),
        cost_estimate=cost,
    )(xp, w_kn, b2d)

    if (Bp, Np) != (B, H_out):
        out_p = out_p[:B, :H_out]
    return out_p


def mlp_layer(features, weight, bias, *, force_pallas=False):
    """features: [B, H_in]; weight: [H_out, H_in] (PyTorch layout); bias: [H_out]."""
    B, H_in = features.shape
    H_out = weight.shape[0]
    assert weight.shape[1] == H_in and bias.shape == (H_out,)

    # Small-problem bypass: at single-grid-point sizes the Pallas call is pure
    # launch + pad/slice overhead; plain XLA fuses into the surrounding graph.
    if not force_pallas and B * H_in * H_out < (1 << 21):
        y = jnp.dot(features, weight.T, preferred_element_type=jnp.float32) + bias
        return jnp.tanh(y).astype(features.dtype)

    fdt = jnp.dtype(features.dtype)
    compute_dtype = (jnp.bfloat16
                     if fdt in (jnp.dtype(jnp.float32), jnp.dtype(jnp.bfloat16))
                     else features.dtype)

    tm, tn, tk = _choose_tiles(B, H_in, H_out, compute_dtype, features.dtype)
    # TODO(synk): in production, prepare_params() runs once at parameter-load
    # time (cached), not inside every forward call.
    w_kn, b2d = prepare_params(weight, bias, tn, tk, compute_dtype)
    return mlp_layer_pallas(features, w_kn, b2d, H_out,
                            tm=tm, tn=tn, tk=tk, compute_dtype=compute_dtype)


# ----------------------------- demo / check --------------------------------
if __name__ == "__main__":
    # Small shapes: batch of 8 CLS vectors, hidden_size = 32.
    B, H = 8, 32
    key = jax.random.PRNGKey(0)
    k_x, k_w, k_b = jax.random.split(key, 3)

    features = jax.random.normal(k_x, (B, H), dtype=jnp.float32)
    bound = 1.0 / (H ** 0.5)
    weight = jax.random.uniform(k_w, (H, H), minval=-bound, maxval=bound,
                                dtype=jnp.float32)
    bias = jax.random.uniform(k_b, (H,), minval=-bound, maxval=bound,
                              dtype=jnp.float32)

    # Force the Pallas path at this tiny size so the kernel itself is exercised.
    out = mlp_layer(features, weight, bias, force_pallas=True)
    jax.block_until_ready(out)

    ref = jnp.tanh(features @ weight.T + bias)
    assert out.shape == (B, H)
    # bf16 MXU inputs with f32 accumulation -> relaxed tolerance vs f32 reference.
    max_err = float(jnp.max(jnp.abs(out - ref)))
    assert jnp.allclose(out, ref, atol=2e-2, rtol=2e-2), max_err

    # Also exercise the small-problem bypass (plain XLA path, full f32).
    out_bypass = mlp_layer(features, weight, bias)
    assert jnp.allclose(out_bypass, ref, atol=1e-4, rtol=1e-4)

    print("KERNEL_OK")
</pallas_src>

<mosaic_0001>
module attributes {stable_mosaic.version = 11 : i64} {
  func.func @_mlp_kernel_f32_out(%arg0: i32, %arg1: i32, %arg2: i32, %arg3: memref<16x128xbf16, #tpu.memory_space<vmem>>, %arg4: memref<128x128xbf16, #tpu.memory_space<vmem>>, %arg5: memref<1x128xf32, #tpu.memory_space<vmem>>, %arg6: memref<16x128xf32, #tpu.memory_space<vmem>>) attributes {dimension_semantics = [#tpu.dimension_semantics<parallel>, #tpu.dimension_semantics<parallel>, #tpu.dimension_semantics<arbitrary>], iteration_bounds = array<i64: 1, 1, 1>, scalar_prefetch = 0 : i64, scratch_operands = 0 : i64, tpu.core_type = #tpu.core_type<tc>, window_params = [{transform_indices = @transform_0, window_bounds = array<i64: 16, 128>}, {transform_indices = @transform_1, window_bounds = array<i64: 128, 128>}, {transform_indices = @transform_2, window_bounds = array<i64: 1, 128>}, {transform_indices = @transform_3, window_bounds = array<i64: 16, 128>}]} {
    %c0_i32 = arith.constant 0 : i32
    %0 = arith.cmpi eq, %arg2, %c0_i32 : i32
    %1 = arith.extui %0 : i1 to i32
    %c0_i32_0 = arith.constant 0 : i32
    %2 = arith.cmpi ne, %1, %c0_i32_0 : i32
    scf.if %2 {
      %cst_10 = arith.constant 0.000000e+00 : f32
      %12 = vector.broadcast %cst_10 : f32 to vector<16x128xf32>
      %c0_11 = arith.constant 0 : index
      %c0_12 = arith.constant 0 : index
      %13 = vector.load %arg6[%c0_11, %c0_12] : memref<16x128xf32, #tpu.memory_space<vmem>>, vector<16x128xf32>
      tpu.vector_store %arg6[%c0_11, %c0_12], %12 {strides = array<i32>} : memref<16x128xf32, #tpu.memory_space<vmem>>, vector<16x128xf32>,
    } else {
    }
    %c0 = arith.constant 0 : index
    %c0_1 = arith.constant 0 : index
    %3 = vector.load %arg6[%c0, %c0_1] : memref<16x128xf32, #tpu.memory_space<vmem>>, vector<16x128xf32>
    %c0_2 = arith.constant 0 : index
    %c0_3 = arith.constant 0 : index
    %4 = vector.load %arg3[%c0_2, %c0_3] : memref<16x128xbf16, #tpu.memory_space<vmem>>, vector<16x128xbf16>
    %c0_4 = arith.constant 0 : index
    %c0_5 = arith.constant 0 : index
    %5 = vector.load %arg4[%c0_4, %c0_5] : memref<128x128xbf16, #tpu.memory_space<vmem>>, vector<128x128xbf16>
    %cst = arith.constant dense<0.000000e+00> : vector<16x128xf32>
    %6 = tpu.matmul %4, %5, %cst {dimension_numbers = #tpu.dot_dimension_numbers<[1], [0], [0], [1], [0, 0, 1, 1], [], []>} : vector<16x128xbf16>, vector<128x128xbf16>, vector<16x128xf32> -> vector<16x128xf32>
    %7 = arith.addf %3, %6 : vector<16x128xf32>
    %c0_6 = arith.constant 0 : index
    %c0_7 = arith.constant 0 : index
    %8 = vector.load %arg6[%c0_6, %c0_7] : memref<16x128xf32, #tpu.memory_space<vmem>>, vector<16x128xf32>
    tpu.vector_store %arg6[%c0_6, %c0_7], %7 {strides = array<i32>} : memref<16x128xf32, #tpu.memory_space<vmem>>, vector<16x128xf32>,
    %c0_i32_8 = arith.constant 0 : i32
    %9 = arith.cmpi eq, %arg2, %c0_i32_8 : i32
    %10 = arith.extui %9 : i1 to i32
    %c0_i32_9 = arith.constant 0 : i32
    %11 = arith.cmpi ne, %10, %c0_i32_9 : i32
    scf.if %11 {
      %c0_10 = arith.constant 0 : index
      %c0_11 = arith.constant 0 : index
      %12 = vector.load %arg6[%c0_10, %c0_11] : memref<16x128xf32, #tpu.memory_space<vmem>>, vector<16x128xf32>
      %c0_12 = arith.constant 0 : index
      %c0_13 = arith.constant 0 : index
      %13 = vector.load %arg5[%c0_12, %c0_13] : memref<1x128xf32, #tpu.memory_space<vmem>>, vector<1x128xf32>
      %14 = vector.broadcast %13 : vector<1x128xf32> to vector<16x128xf32>
      %15 = arith.addf %12, %14 : vector<16x128xf32>
      %16 = math.tanh %15 : vector<16x128xf32>
      %c0_14 = arith.constant 0 : index
      %c0_15 = arith.constant 0 : index
      %17 = vector.load %arg6[%c0_14, %c0_15] : memref<16x128xf32, #tpu.memory_space<vmem>>, vector<16x128xf32>
      tpu.vector_store %arg6[%c0_14, %c0_15], %16 {strides = array<i32>} : memref<16x128xf32, #tpu.memory_space<vmem>>, vector<16x128xf32>,
    } else {
    }
    return
  }
  func.func @transform_0(%arg0: i32, %arg1: i32, %arg2: i32) -> (i32, i32) {
    %c0_i32 = arith.constant 0 : i32
    return %arg0, %arg2 : i32, i32
  }
  func.func @transform_1(%arg0: i32, %arg1: i32, %arg2: i32) -> (i32, i32) {
    %c0_i32 = arith.constant 0 : i32
    return %arg2, %arg1 : i32, i32
  }
  func.func @transform_2(%arg0: i32, %arg1: i32, %arg2: i32) -> (i32, i32) {
    %c0_i32 = arith.constant 0 : i32
    %c0_i32_0 = arith.constant 0 : i32
    return %c0_i32, %arg1 : i32, i32
  }
  func.func @transform_3(%arg0: i32, %arg1: i32, %arg2: i32) -> (i32, i32) {
    %c0_i32 = arith.constant 0 : i32
    return %arg0, %arg1 : i32, i32
  }
}

</mosaic_0001>

<bundles_post_ra>
// kernel: tpu_custom_call.1
= control target key start
LH: loop header
LB: loop body
LE: loop exit
PB: predicated region body
PF: predicated region fallthrough
CT: control target
= control target key end

     0   :  { %8 = vsyncpa [#allocation3], 0  ;;  %s355_s0 = inlined_call_operand.hbm [shape: bf16[16,128], index: 0, kind: input, shape index: {}]   ;;  %s356_s1 = inlined_call_operand.hbm [shape: bf16[128,128], index: 1, kind: input, shape index: {}]   ;;  %s357_s2 = inlined_call_operand.vmem [shape: f32[1,128], index: 2, kind: input, shape index: {}]   ;;  %s358_s3 = inlined_call_operand.hbm [shape: f32[16,128], index: 3, kind: output, shape index: {}]  }
   0x1   :  { %9 = vsyncpa [#allocation6], 0 }
   0x2   :  { %10 = vsyncpa [#allocation4], 0  ;;  %s15_s14 = sshll.u32 %s355_s0, 4  ;;  %s316_s15 = smov [#allocation2]   ;;  %s16_s14 = int_to_ptr.hbm [resolvable:$true] %s15_s14 }
   0x3   :  { %s17_s16 = sshll.u32 %s316_s15, 4  ;;  %s28_s19 = sshll.u32 %s356_s1, 4  ;;  %s18_s16 = int_to_ptr.vmem [resolvable:$true] %s17_s16  ;;  %s29_s19 = int_to_ptr.hbm [resolvable:$true] %s28_s19 }
   0x4   :  { %s317_s20 = smov 64   ;;  %s318_s21 = smov 4  }
   0x5   :  { %23 = dma.hbm_to_vmem [thread:$0]  %s16_s14, 128, %s18_s16, [#allocation3], %s317_s20, %s317_s20, %s318_s21  }
   0x6   :  { %s319_s22 = smov [#allocation5]  }
   0x7   :  { %s30_s23 = sshll.u32 %s319_s22, 4  ;;  %s31_s23 = int_to_ptr.vmem [resolvable:$true] %s30_s23 }
   0x8   :  { %36 = dma.hbm_to_vmem [thread:$0]  %s29_s19, 1024, %s31_s23, [#allocation6], %s317_s20, %s317_s20, %s318_s21  }
   0x9   :  { %310 = dma.done.wait [#allocation3], 128  }
   0xa   :  { %311 = vsyncadd [#allocation3], 4294967168 }
   0xb   :  { %312 = dma.done.wait [#allocation6], 1024  }
   0xc   :  { %313 = vsyncadd [#allocation6], 4294966272  ;;  %v224_v0 = vld [vmem:[#allocation5 + $0x38] sm:$0xff]  ;;  %v223_v1 = vld [vmem:[#allocation5 + $0x30] sm:$0xff]  ;;  %s320_s24 = smov [#allocation7]   ;;  %s166_s28 = sshll.u32 %s358_s3, 4  ;;  %s167_s28 = int_to_ptr.hbm [resolvable:$true] %s166_s28 }
   0xd   :  { %127 = vmatpush.bf16.msra.mxu0 %v224_v0  ;;  %v222_v2 = vld [vmem:[#allocation5 + $0x28] sm:$0xff]  ;;  %v221_v3 = vld [vmem:[#allocation5 + $0x20] sm:$0xff]  ;;  %v220_v4 = vld [vmem:[#allocation5 + $0x18] sm:$0xff]  ;;  %s164_s25 = sshll.u32 %s320_s24, 4  ;;  %s321_s29 = smov 128   ;;  %s165_s25 = int_to_ptr.vmem [resolvable:$true] %s164_s25 }
   0xe   :  { %v219_v5 = vld [vmem:[#allocation5 + $0x10] sm:$0xff]  ;;  %v218_v6 = vld [vmem:[#allocation5 + $0x8] sm:$0xff]  ;;  %v217_v7 = vld [vmem:[#allocation5] sm:$0xff] }
   0xf   :  { %v216_v8 = vld [vmem:[#allocation2] sm:$0xff] }
  0x10   :  { %v233_v9 = vld [vmem:[%s357_s2] ss:$0 sm:$0xff]  ;;  %s322_s2 = smov 8  }
  0x11   :  { %128 = vmatpush.bf16.msra.mxu0 %v223_v1 }
  0x15   :  { %129 = vmatpush.bf16.msra.mxu0 %v222_v2 }
  0x19   :  { %130 = vmatpush.bf16.msra.mxu0 %v221_v3 }
  0x1d   :  { %131 = vmatpush.bf16.msra.mxu0 %v220_v4 }
  0x21   :  { %132 = vmatpush.bf16.msra.mxu0 %v219_v5 }
  0x25   :  { %133 = vmatpush.bf16.msra.mxu0 %v218_v6 }
  0x29   :  { %134 = vmatpush.bf16.msra.mxu0 %v217_v7 }
  0x2c   :  { %135 = vmatmul.bf16.vlgmr.msra.gmra.mxu0 %v216_v8 }
  0xa9   :  { %v136_v10 = vpop.f32.mrf.mxu0 }
  0xaa   :  { %v154_v11 = vadd.f32 %v233_v9, %v136_v10 }
  0xac   :  { %234 = vtanh.f32 %v154_v11 }
  0xb1   :  { %v138_v12 = vpop.f32.mrf.mxu0 }
  0xb2   :  { %v235_v13 = vpop.eup %234  ;;  %v155_v14 = vadd.f32 %v233_v9, %v138_v12 }
  0xb3   :  { %158 = vst [vmem:[#allocation7] sm:$0xff] %v235_v13 }
  0xb4   :  { %236 = vtanh.f32 %v155_v14 }
  0xba   :  { %v237_v15 = vpop.eup %236 }
  0xbb   :  { %159 = vst [vmem:[#allocation7 + $0x8] sm:$0xff] %v237_v15 }
  0xbc   :  { %172 = dma.vmem_to_hbm [thread:$0]  %s165_s25, 256, %s167_s28, [#allocation4], %s321_s29, %s321_s29, %s322_s2  }
  0xbd   :  { %314 = dma.done.wait [#allocation4], 256  }
  0xbe   :  { %315 = vsyncadd [#allocation4], 4294967040 }
  0xbf   :  { %177 = vsyncpa [#allocation3], 1 }
  0xc0   :  { %178 = vsyncpa [#allocation6], 1 }
  0xc1   :  { %179 = vsyncpa [#allocation4], 1 }

</bundles_post_ra>
